<compile_context>
chip_gen: v6e
topology: v6e:2x2x1
jax: 0.10.0
libtpu: 0.0.40
codegen_flags: <defaults>
</compile_context>

<pallas_src>
import jax
import jax.numpy as jnp
from jax.experimental import pallas as pl
from jax.experimental.pallas import tpu as pltpu

NEG_BIG = -1.0e9   # value FilterLegalMoves assigns to masked-out / zero logits
LANE = 128         # TPU lane width; hidden dims are padded to a multiple of this


def _round_up(n, m):
    return ((n + m - 1) // m) * m


def _pad_to(a, shape):
    pads = [(0, t - s) for s, t in zip(a.shape, shape)]
    if all(p == (0, 0) for p in pads):
        return a
    return jnp.pad(a, pads)


# -----------------------------------------------------------------------------
# Kernel: 4-layer actor MLP + FilterLegalMoves; one batch tile per grid step.
# -----------------------------------------------------------------------------
def mlp_agent_kernel(x_ref, w1_ref, b1_ref, w2_ref, b2_ref,
                     w3_ref, b3_ref, w4_ref, b4_ref, mask_ref, out_ref):
    """
    x:    (TILE_B, input_dim)  bf16   -- streamed per grid step
    wN:   bf16, (in, out) layout      -- VMEM resident (constant index_map)
    bN:   (1, out) f32
    mask: (TILE_B, output_dim) f32    -- 1.0 where move is legal, else 0.0
    out:  (TILE_B, output_dim) f32    -- filtered logits
    """
    h = jnp.dot(x_ref[...], w1_ref[...], preferred_element_type=jnp.float32)
    h = jnp.maximum(h + b1_ref[...], 0.0)      # ReLU (Dropout = identity in eval)

    h = jnp.dot(h.astype(jnp.bfloat16), w2_ref[...],
                preferred_element_type=jnp.float32)
    h = jnp.maximum(h + b2_ref[...], 0.0)

    h = jnp.dot(h.astype(jnp.bfloat16), w3_ref[...],
                preferred_element_type=jnp.float32)
    h = jnp.maximum(h + b3_ref[...], 0.0)

    logits = jnp.dot(h.astype(jnp.bfloat16), w4_ref[...],
                     preferred_element_type=jnp.float32)
    logits = logits + b4_ref[...]

    # FilterLegalMoves: masked = logits * mask; masked[masked == 0] = -1e9.
    # Single-select equivalent (illegal lane OR exactly-zero logit -> NEG_BIG).
    illegal = (mask_ref[...] == 0.0) | (logits == 0.0)
    out_ref[...] = jnp.where(illegal, NEG_BIG, logits)


# -----------------------------------------------------------------------------
# Parameter construction / one-time preparation (plain-JAX glue).
# -----------------------------------------------------------------------------
def init_mlp_params(key, input_dim, d_model, output_dim, std_out=0.01):
    """Orthogonal init matching layer_init: gain sqrt(2) for hidden layers,
    std_out for the output layer, zero biases. Weights stored (in, out)."""
    ks = jax.random.split(key, 4)
    ortho = jax.nn.initializers.orthogonal
    dims = [(input_dim, d_model), (d_model, 2 * d_model),
            (2 * d_model, d_model), (d_model, output_dim)]
    gains = [2.0 ** 0.5, 2.0 ** 0.5, 2.0 ** 0.5, std_out]
    params = {}
    for i, ((din, dout), g, k) in enumerate(zip(dims, gains, ks), start=1):
        params[f"w{i}"] = ortho(scale=g)(k, (din, dout), jnp.float32)
        params[f"b{i}"] = jnp.zeros((1, dout), jnp.float32)
    return params


def prepare_params(params):
    """One-time prep: zero-pad hidden widths to the 128-lane boundary and cast
    weights to bf16 (biases stay f32 for the f32 epilogue).  Padded rows/cols
    are zero, so padded hidden units are exactly 0 after ReLU and never leak
    into real outputs."""
    in_dim = params["w1"].shape[0]
    d1, d2, d3 = params["w1"].shape[1], params["w2"].shape[1], params["w3"].shape[1]
    out_dim = params["w4"].shape[1]
    d1p, d2p, d3p = (_round_up(d, LANE) for d in (d1, d2, d3))

    return {
        "w1": _pad_to(params["w1"], (in_dim, d1p)).astype(jnp.bfloat16),
        "b1": _pad_to(params["b1"], (1, d1p)),
        "w2": _pad_to(params["w2"], (d1p, d2p)).astype(jnp.bfloat16),
        "b2": _pad_to(params["b2"], (1, d2p)),
        "w3": _pad_to(params["w3"], (d2p, d3p)).astype(jnp.bfloat16),
        "b3": _pad_to(params["b3"], (1, d3p)),
        "w4": _pad_to(params["w4"], (d3p, out_dim)).astype(jnp.bfloat16),
        "b4": params["b4"],
    }


# -----------------------------------------------------------------------------
# Wrapper: gridded pallas_call (batch-tiled stream, resident weights).
# -----------------------------------------------------------------------------
def mlp_agent_forward(x_flat, pparams, mask, *, tile_b=None):
    """Actor forward.  `pparams` must come from prepare_params()."""
    B, input_dim = x_flat.shape
    output_dim = pparams["w4"].shape[1]

    if tile_b is None:
        # >=256 rows fills the MXU M dim on v6e/v7x; small batches round to 16
        # (bf16 sublane packing).  Multiples of 16 keep block shapes legal.
        tile_b = 256 if B >= 256 else _round_up(max(B, 1), 16)
    tile_b = _round_up(tile_b, 16)
    b_pad = _round_up(B, tile_b)

    x = _pad_to(x_flat.astype(jnp.bfloat16), (b_pad, input_dim))
    mask_p = _pad_to(mask.astype(jnp.float32), (b_pad, output_dim))

    grid = (b_pad // tile_b,)

    def const_spec(shape):
        return pl.BlockSpec(shape, lambda i: (0, 0))      # resident across tiles

    in_specs = [
        pl.BlockSpec((tile_b, input_dim), lambda i: (i, 0)),   # x (streamed)
        const_spec(pparams["w1"].shape), const_spec(pparams["b1"].shape),
        const_spec(pparams["w2"].shape), const_spec(pparams["b2"].shape),
        const_spec(pparams["w3"].shape), const_spec(pparams["b3"].shape),
        const_spec(pparams["w4"].shape), const_spec(pparams["b4"].shape),
        pl.BlockSpec((tile_b, output_dim), lambda i: (i, 0)),  # mask (streamed)
    ]
    out_spec = pl.BlockSpec((tile_b, output_dim), lambda i: (i, 0))

    # Scheduling hints: cost estimate + explicit VMEM budget.
    d1p = pparams["w1"].shape[1]
    d2p = pparams["w2"].shape[1]
    d3p = pparams["w3"].shape[1]
    weight_bytes = sum(int(v.size) * v.dtype.itemsize for v in pparams.values())
    flops = 2 * b_pad * (input_dim * d1p + d1p * d2p + d2p * d3p + d3p * output_dim)
    bytes_accessed = (b_pad * input_dim * 2            # x stream (bf16)
                      + 2 * b_pad * output_dim * 4     # mask + out (f32)
                      + weight_bytes)                  # weights once

    stream_vmem = (2 * tile_b * input_dim * 2          # x double-buffered (bf16)
                   + 4 * tile_b * output_dim * 4)      # mask + out double-buffered
    vmem_limit = int(min(max(stream_vmem + 2 * weight_bytes + (8 << 20), 16 << 20),
                         48 << 20))                    # stay under v7x's 64 MiB

    out = pl.pallas_call(
        mlp_agent_kernel,
        out_shape=jax.ShapeDtypeStruct((b_pad, output_dim), jnp.float32),
        grid=grid,
        in_specs=in_specs,
        out_specs=out_spec,
        compiler_params=pltpu.CompilerParams(
            dimension_semantics=("parallel",),          # megacore-shard batch (v7x)
            vmem_limit_bytes=vmem_limit),
        cost_estimate=pl.CostEstimate(
            flops=flops, transcendentals=0, bytes_accessed=bytes_accessed),
    )(x,
      pparams["w1"], pparams["b1"],
      pparams["w2"], pparams["b2"],
      pparams["w3"], pparams["b3"],
      pparams["w4"], pparams["b4"],
      mask_p)

    return out[:B]


# -----------------------------------------------------------------------------
# Plain-JAX reference mirroring the kernel numerics (bf16 dots, f32 accumulate)
# with the *original* FilterLegalMoves multiply-then-replace semantics.
# -----------------------------------------------------------------------------
def reference_forward(x_flat, pparams, mask):
    f32 = jnp.float32
    h = jnp.dot(x_flat.astype(jnp.bfloat16), pparams["w1"],
                preferred_element_type=f32) + pparams["b1"]
    h = jnp.maximum(h, 0.0)
    h = jnp.dot(h.astype(jnp.bfloat16), pparams["w2"],
                preferred_element_type=f32) + pparams["b2"]
    h = jnp.maximum(h, 0.0)
    h = jnp.dot(h.astype(jnp.bfloat16), pparams["w3"],
                preferred_element_type=f32) + pparams["b3"]
    h = jnp.maximum(h, 0.0)
    logits = jnp.dot(h.astype(jnp.bfloat16), pparams["w4"],
                     preferred_element_type=f32) + pparams["b4"]
    masked = logits * mask
    return jnp.where(masked == 0.0, NEG_BIG, masked)


if __name__ == "__main__":
    key = jax.random.PRNGKey(0)
    k_x, k_p = jax.random.split(key)

    # Small synthetic config consistent with MlpAgent:
    #   observation space (C, H, W) = (4, 16, 16) -> input_dim = 1024
    #   action space n = 128, d_model = 32
    B, C, H, W = 2, 4, 16, 16
    input_dim = C * H * W
    d_model = 32
    output_dim = 128

    # NCHW observation batch -> _preprocess flattens to (B, input_dim)
    x = jax.random.normal(k_x, (B, C, H, W), dtype=jnp.float32)
    x_flat = x.reshape(-1, input_dim)

    params = init_mlp_params(k_p, input_dim, d_model, output_dim, std_out=0.01)
    pparams = prepare_params(params)     # one-time pad-to-lane + bf16 cast

    # possible_moves: per-batch lists of legal action indices -> dense mask (glue)
    possible_moves = [
        jnp.array([0, 5, 17, 42, 63, 100], dtype=jnp.int32),
        jnp.array([3, 7, 64, 99, 127], dtype=jnp.int32),
    ]
    mask = jnp.zeros((B, output_dim), dtype=jnp.float32)
    for i, pm in enumerate(possible_moves):
        mask = mask.at[i, pm].set(1.0)

    logits = mlp_agent_forward(x_flat, pparams, mask)
    jax.block_until_ready(logits)

    ref = reference_forward(x_flat, pparams, mask)
    assert logits.shape == (B, output_dim)
    assert jnp.allclose(logits, ref, rtol=1e-3, atol=1e-2), "mismatch vs JAX reference"

    print("KERNEL_OK")
</pallas_src>

<mosaic_0001>
module attributes {stable_mosaic.version = 11 : i64} {
  func.func @mlp_agent_kernel(%arg0: i32, %arg1: memref<16x1024xbf16, #tpu.memory_space<vmem>>, %arg2: memref<1024x128xbf16, #tpu.memory_space<vmem>>, %arg3: memref<1x128xf32, #tpu.memory_space<vmem>>, %arg4: memref<128x128xbf16, #tpu.memory_space<vmem>>, %arg5: memref<1x128xf32, #tpu.memory_space<vmem>>, %arg6: memref<128x128xbf16, #tpu.memory_space<vmem>>, %arg7: memref<1x128xf32, #tpu.memory_space<vmem>>, %arg8: memref<128x128xbf16, #tpu.memory_space<vmem>>, %arg9: memref<1x128xf32, #tpu.memory_space<vmem>>, %arg10: memref<16x128xf32, #tpu.memory_space<vmem>>, %arg11: memref<16x128xf32, #tpu.memory_space<vmem>>) attributes {dimension_semantics = [#tpu.dimension_semantics<parallel>], iteration_bounds = array<i64: 1>, scalar_prefetch = 0 : i64, scratch_operands = 0 : i64, tpu.core_type = #tpu.core_type<tc>, window_params = [{transform_indices = @transform_0, window_bounds = array<i64: 16, 1024>}, {pipeline_mode = #tpu.pipeline_mode<synchronous>, transform_indices = @transform_1, window_bounds = array<i64: 1024, 128>}, {pipeline_mode = #tpu.pipeline_mode<synchronous>, transform_indices = @transform_2, window_bounds = array<i64: 1, 128>}, {pipeline_mode = #tpu.pipeline_mode<synchronous>, transform_indices = @transform_3, window_bounds = array<i64: 128, 128>}, {pipeline_mode = #tpu.pipeline_mode<synchronous>, transform_indices = @transform_4, window_bounds = array<i64: 1, 128>}, {pipeline_mode = #tpu.pipeline_mode<synchronous>, transform_indices = @transform_5, window_bounds = array<i64: 128, 128>}, {pipeline_mode = #tpu.pipeline_mode<synchronous>, transform_indices = @transform_6, window_bounds = array<i64: 1, 128>}, {pipeline_mode = #tpu.pipeline_mode<synchronous>, transform_indices = @transform_7, window_bounds = array<i64: 128, 128>}, {pipeline_mode = #tpu.pipeline_mode<synchronous>, transform_indices = @transform_8, window_bounds = array<i64: 1, 128>}, {transform_indices = @transform_9, window_bounds = array<i64: 16, 128>}, {transform_indices = @transform_10, window_bounds = array<i64: 16, 128>}]} {
    %c0 = arith.constant 0 : index
    %c0_0 = arith.constant 0 : index
    %0 = vector.load %arg1[%c0, %c0_0] : memref<16x1024xbf16, #tpu.memory_space<vmem>>, vector<16x1024xbf16>
    %c0_1 = arith.constant 0 : index
    %c0_2 = arith.constant 0 : index
    %1 = vector.load %arg2[%c0_1, %c0_2] : memref<1024x128xbf16, #tpu.memory_space<vmem>>, vector<1024x128xbf16>
    %cst = arith.constant dense<0.000000e+00> : vector<16x128xf32>
    %2 = tpu.matmul %0, %1, %cst {dimension_numbers = #tpu.dot_dimension_numbers<[1], [0], [0], [1], [0, 0, 1, 1], [], []>} : vector<16x1024xbf16>, vector<1024x128xbf16>, vector<16x128xf32> -> vector<16x128xf32>
    %c0_3 = arith.constant 0 : index
    %c0_4 = arith.constant 0 : index
    %3 = vector.load %arg3[%c0_3, %c0_4] : memref<1x128xf32, #tpu.memory_space<vmem>>, vector<1x128xf32>
    %4 = vector.broadcast %3 : vector<1x128xf32> to vector<16x128xf32>
    %5 = arith.addf %2, %4 : vector<16x128xf32>
    %cst_5 = arith.constant 0.000000e+00 : f32
    %6 = vector.broadcast %cst_5 : f32 to vector<16x128xf32>
    %7 = arith.maximumf %5, %6 : vector<16x128xf32>
    %8 = arith.truncf %7 : vector<16x128xf32> to vector<16x128xbf16>
    %c0_6 = arith.constant 0 : index
    %c0_7 = arith.constant 0 : index
    %9 = vector.load %arg4[%c0_6, %c0_7] : memref<128x128xbf16, #tpu.memory_space<vmem>>, vector<128x128xbf16>
    %cst_8 = arith.constant dense<0.000000e+00> : vector<16x128xf32>
    %10 = tpu.matmul %8, %9, %cst_8 {dimension_numbers = #tpu.dot_dimension_numbers<[1], [0], [0], [1], [0, 0, 1, 1], [], []>} : vector<16x128xbf16>, vector<128x128xbf16>, vector<16x128xf32> -> vector<16x128xf32>
    %c0_9 = arith.constant 0 : index
    %c0_10 = arith.constant 0 : index
    %11 = vector.load %arg5[%c0_9, %c0_10] : memref<1x128xf32, #tpu.memory_space<vmem>>, vector<1x128xf32>
    %12 = vector.broadcast %11 : vector<1x128xf32> to vector<16x128xf32>
    %13 = arith.addf %10, %12 : vector<16x128xf32>
    %cst_11 = arith.constant 0.000000e+00 : f32
    %14 = vector.broadcast %cst_11 : f32 to vector<16x128xf32>
    %15 = arith.maximumf %13, %14 : vector<16x128xf32>
    %16 = arith.truncf %15 : vector<16x128xf32> to vector<16x128xbf16>
    %c0_12 = arith.constant 0 : index
    %c0_13 = arith.constant 0 : index
    %17 = vector.load %arg6[%c0_12, %c0_13] : memref<128x128xbf16, #tpu.memory_space<vmem>>, vector<128x128xbf16>
    %cst_14 = arith.constant dense<0.000000e+00> : vector<16x128xf32>
    %18 = tpu.matmul %16, %17, %cst_14 {dimension_numbers = #tpu.dot_dimension_numbers<[1], [0], [0], [1], [0, 0, 1, 1], [], []>} : vector<16x128xbf16>, vector<128x128xbf16>, vector<16x128xf32> -> vector<16x128xf32>
    %c0_15 = arith.constant 0 : index
    %c0_16 = arith.constant 0 : index
    %19 = vector.load %arg7[%c0_15, %c0_16] : memref<1x128xf32, #tpu.memory_space<vmem>>, vector<1x128xf32>
    %20 = vector.broadcast %19 : vector<1x128xf32> to vector<16x128xf32>
    %21 = arith.addf %18, %20 : vector<16x128xf32>
    %cst_17 = arith.constant 0.000000e+00 : f32
    %22 = vector.broadcast %cst_17 : f32 to vector<16x128xf32>
    %23 = arith.maximumf %21, %22 : vector<16x128xf32>
    %24 = arith.truncf %23 : vector<16x128xf32> to vector<16x128xbf16>
    %c0_18 = arith.constant 0 : index
    %c0_19 = arith.constant 0 : index
    %25 = vector.load %arg8[%c0_18, %c0_19] : memref<128x128xbf16, #tpu.memory_space<vmem>>, vector<128x128xbf16>
    %cst_20 = arith.constant dense<0.000000e+00> : vector<16x128xf32>
    %26 = tpu.matmul %24, %25, %cst_20 {dimension_numbers = #tpu.dot_dimension_numbers<[1], [0], [0], [1], [0, 0, 1, 1], [], []>} : vector<16x128xbf16>, vector<128x128xbf16>, vector<16x128xf32> -> vector<16x128xf32>
    %c0_21 = arith.constant 0 : index
    %c0_22 = arith.constant 0 : index
    %27 = vector.load %arg9[%c0_21, %c0_22] : memref<1x128xf32, #tpu.memory_space<vmem>>, vector<1x128xf32>
    %28 = vector.broadcast %27 : vector<1x128xf32> to vector<16x128xf32>
    %29 = arith.addf %26, %28 : vector<16x128xf32>
    %c0_23 = arith.constant 0 : index
    %c0_24 = arith.constant 0 : index
    %30 = vector.load %arg10[%c0_23, %c0_24] : memref<16x128xf32, #tpu.memory_space<vmem>>, vector<16x128xf32>
    %cst_25 = arith.constant 0.000000e+00 : f32
    %31 = vector.broadcast %cst_25 : f32 to vector<16x128xf32>
    %32 = arith.cmpf oeq, %30, %31 : vector<16x128xf32>
    %cst_26 = arith.constant 0.000000e+00 : f32
    %33 = vector.broadcast %cst_26 : f32 to vector<16x128xf32>
    %34 = arith.cmpf oeq, %29, %33 : vector<16x128xf32>
    %35 = arith.ori %32, %34 : vector<16x128xi1>
    %cst_27 = arith.constant -1.000000e+09 : f32
    %36 = vector.broadcast %cst_27 : f32 to vector<16x128xf32>
    %37 = arith.select %35, %36, %29 : vector<16x128xi1>, vector<16x128xf32>
    %c0_28 = arith.constant 0 : index
    %c0_29 = arith.constant 0 : index
    %38 = vector.load %arg11[%c0_28, %c0_29] : memref<16x128xf32, #tpu.memory_space<vmem>>, vector<16x128xf32>
    tpu.vector_store %arg11[%c0_28, %c0_29], %37 {strides = array<i32>} : memref<16x128xf32, #tpu.memory_space<vmem>>, vector<16x128xf32>,
    return
  }
  func.func @transform_0(%arg0: i32) -> (i32, i32) {
    %c0_i32 = arith.constant 0 : i32
    %c0_i32_0 = arith.constant 0 : i32
    return %arg0, %c0_i32 : i32, i32
  }
  func.func @transform_1(%arg0: i32) -> (i32, i32) {
    %c0_i32 = arith.constant 0 : i32
    %c0_i32_0 = arith.constant 0 : i32
    %c0_i32_1 = arith.constant 0 : i32
    return %c0_i32, %c0_i32_0 : i32, i32
  }
  func.func @transform_2(%arg0: i32) -> (i32, i32) {
    %c0_i32 = arith.constant 0 : i32
    %c0_i32_0 = arith.constant 0 : i32
    %c0_i32_1 = arith.constant 0 : i32
    return %c0_i32, %c0_i32_0 : i32, i32
  }
  func.func @transform_3(%arg0: i32) -> (i32, i32) {
    %c0_i32 = arith.constant 0 : i32
    %c0_i32_0 = arith.constant 0 : i32
    %c0_i32_1 = arith.constant 0 : i32
    return %c0_i32, %c0_i32_0 : i32, i32
  }
  func.func @transform_4(%arg0: i32) -> (i32, i32) {
    %c0_i32 = arith.constant 0 : i32
    %c0_i32_0 = arith.constant 0 : i32
    %c0_i32_1 = arith.constant 0 : i32
    return %c0_i32, %c0_i32_0 : i32, i32
  }
  func.func @transform_5(%arg0: i32) -> (i32, i32) {
    %c0_i32 = arith.constant 0 : i32
    %c0_i32_0 = arith.constant 0 : i32
    %c0_i32_1 = arith.constant 0 : i32
    return %c0_i32, %c0_i32_0 : i32, i32
  }
  func.func @transform_6(%arg0: i32) -> (i32, i32) {
    %c0_i32 = arith.constant 0 : i32
    %c0_i32_0 = arith.constant 0 : i32
    %c0_i32_1 = arith.constant 0 : i32
    return %c0_i32, %c0_i32_0 : i32, i32
  }
  func.func @transform_7(%arg0: i32) -> (i32, i32) {
    %c0_i32 = arith.constant 0 : i32
    %c0_i32_0 = arith.constant 0 : i32
    %c0_i32_1 = arith.constant 0 : i32
    return %c0_i32, %c0_i32_0 : i32, i32
  }
  func.func @transform_8(%arg0: i32) -> (i32, i32) {
    %c0_i32 = arith.constant 0 : i32
    %c0_i32_0 = arith.constant 0 : i32
    %c0_i32_1 = arith.constant 0 : i32
    return %c0_i32, %c0_i32_0 : i32, i32
  }
  func.func @transform_9(%arg0: i32) -> (i32, i32) {
    %c0_i32 = arith.constant 0 : i32
    %c0_i32_0 = arith.constant 0 : i32
    return %arg0, %c0_i32 : i32, i32
  }
  func.func @transform_10(%arg0: i32) -> (i32, i32) {
    %c0_i32 = arith.constant 0 : i32
    %c0_i32_0 = arith.constant 0 : i32
    return %arg0, %c0_i32 : i32, i32
  }
}

</mosaic_0001>

<bundles_post_ra>
// kernel: tpu_custom_call.1
= control target key start
LH: loop header
LB: loop body
LE: loop exit
PB: predicated region body
PF: predicated region fallthrough
CT: control target
= control target key end

     0   :  { %15 = vsyncpa [#allocation3], 0  ;;  %s2004_s0 = inlined_call_operand.hbm [shape: bf16[16,1024], index: 0, kind: input, shape index: {}]   ;;  %s2005_s1 = inlined_call_operand.hbm [shape: bf16[1024,128], index: 1, kind: input, shape index: {}]   ;;  %s2006_s2 = inlined_call_operand.hbm [shape: f32[1,128], index: 2, kind: input, shape index: {}]   ;;  %s2007_s3 = inlined_call_operand.hbm [shape: bf16[128,128], index: 3, kind: input, shape index: {}]   ;;  %s2008_s4 = inlined_call_operand.hbm [shape: f32[1,128], index: 4, kind: input, shape index: {}]   ;;  %s2009_s5 = inlined_call_operand.hbm [shape: bf16[128,128], index: 5, kind: input, shape index: {}]   ;;  %s2010_s6 = inlined_call_operand.hbm [shape: f32[1,128], index: 6, kind: input, shape index: {}]   ;;  %s2011_s7 = inlined_call_operand.hbm [shape: bf16[128,128], index: 7, kind: input, shape index: {}]   ;;  %s2012_s8 = inlined_call_operand.hbm [shape: f32[1,128], index: 8, kind: input, shape index: {}]   ;;  %s2013_s9 = inlined_call_operand.vmem [shape: f32[16,128], index: 9, kind: input, shape index: {}]   ;;  %s2014_s10 = inlined_call_operand.hbm [shape: f32[16,128], index: 10, kind: output, shape index: {}]  }
   0x1   :  { %16 = vsyncpa [#allocation6], 0 }
   0x2   :  { %17 = vsyncpa [#allocation9], 0 }
   0x3   :  { %18 = vsyncpa [#allocation12], 0 }
   0x4   :  { %19 = vsyncpa [#allocation15], 0 }
   0x5   :  { %20 = vsyncpa [#allocation4], 0  ;;  %s1853_s13 = smov [#allocation5]  }
   0x6   :  { %s38_s14 = sshll.u32 %s1853_s13, 4  ;;  %s39_s14 = int_to_ptr.vmem [resolvable:$true] %s38_s14 }
   0x7   :  { %s1649_s15 = scalar_lea.vmem %s39_s14, 8192  ;;  %p1654_p1 = scmp.lt.s32.totalorder %s39_s14, %s39_s14 }
   0x8   :  { %p1650_p0 = scmp.ne.s32.totalorder %s39_s14, %s1649_s15  ;;  %p1655_p2 = scmp.lt.s32.totalorder %s1649_s15, %s1649_s15 }
   0xa   :  { %p1656_p3 = por %p1655_p2, %p1654_p1 }
   0xc   :  { %p1657_p4 = pnand %p1656_p3, %p1650_p0 }
   0xe   :  { %1660 = shalt.err (!%p1657_p4)
}
   0xf   :  { %s1854_s16 = smov 64   ;;  %s1855_s17 = smov 4  }
  0x10   :  { %44 = dma.hbm_to_vmem [thread:$0]  %s2005_s1, 8192, %s39_s14, [#allocation6], %s1854_s16, %s1854_s16, %s1855_s17  }
  0x11   :  { %s1856_s20 = smov [#allocation8]   ;;  %s1857_s22 = smov [#allocation11]  }
  0x12   :  { %s60_s21 = sshll.u32 %s1856_s20, 4  ;;  %s82_s23 = sshll.u32 %s1857_s22, 4  ;;  %s61_s21 = int_to_ptr.vmem [resolvable:$true] %s60_s21  ;;  %s83_s23 = int_to_ptr.vmem [resolvable:$true] %s82_s23 }
  0x13   :  { %s1669_s24 = scalar_lea.vmem %s61_s21, 1024  ;;  %p1674_p6 = scmp.lt.s32.totalorder %s61_s21, %s61_s21 }
  0x14   :  { %p1670_p5 = scmp.ne.s32.totalorder %s61_s21, %s1669_s24  ;;  %p1675_p7 = scmp.lt.s32.totalorder %s1669_s24, %s1669_s24 }
  0x16   :  { %p1676_p8 = por %p1675_p7, %p1674_p6 }
  0x18   :  { %p1677_p9 = pnand %p1676_p8, %p1670_p5 }
  0x1a   :  { %1680 = shalt.err (!%p1677_p9)
}
  0x1b   :  { %66 = dma.hbm_to_vmem [thread:$0]  %s2007_s3, 1024, %s61_s21, [#allocation9], %s1854_s16, %s1854_s16, %s1855_s17  }
  0x1c   :  { %s1689_s1 = scalar_lea.vmem %s83_s23, 1024  ;;  %p1694_p11 = scmp.lt.s32.totalorder %s83_s23, %s83_s23 }
  0x1d   :  { %p1690_p10 = scmp.ne.s32.totalorder %s83_s23, %s1689_s1  ;;  %p1695_p12 = scmp.lt.s32.totalorder %s1689_s1, %s1689_s1 }
  0x1f   :  { %p1696_p13 = por %p1695_p12, %p1694_p11 }
  0x21   :  { %p1697_p0 = pnand %p1696_p13, %p1690_p10 }
  0x23   :  { %1700 = shalt.err (!%p1697_p0)
}
  0x24   :  { %88 = dma.hbm_to_vmem [thread:$0]  %s2009_s5, 1024, %s83_s23, [#allocation12], %s1854_s16, %s1854_s16, %s1855_s17  }
  0x25   :  { %s1858_s29 = smov [#allocation14]   ;;  %s1859_s11 = smov [#allocation2]  }
  0x26   :  { %s104_s30 = sshll.u32 %s1858_s29, 4  ;;  %s26_s3 = sshll.u32 %s1859_s11, 4  ;;  %s105_s30 = int_to_ptr.vmem [resolvable:$true] %s104_s30  ;;  %s27_s3 = int_to_ptr.vmem [resolvable:$true] %s26_s3 }
  0x27   :  { %s1709_s12 = scalar_lea.vmem %s105_s30, 1024  ;;  %p1714_p2 = scmp.lt.s32.totalorder %s105_s30, %s105_s30 }
  0x28   :  { %p1710_p1 = scmp.ne.s32.totalorder %s105_s30, %s1709_s12  ;;  %p1715_p3 = scmp.lt.s32.totalorder %s1709_s12, %s1709_s12 }
  0x2a   :  { %p1716_p4 = por %p1715_p3, %p1714_p2 }
  0x2c   :  { %p1717_p5 = pnand %p1716_p4, %p1710_p1 }
  0x2e   :  { %1720 = shalt.err (!%p1717_p5)
}
  0x2f   :  { %110 = dma.hbm_to_vmem [thread:$0]  %s2011_s7, 1024, %s105_s30, [#allocation15], %s1854_s16, %s1854_s16, %s1855_s17  }
  0x30   :  { %s1729_s5 = scalar_lea.vmem %s27_s3, 1024  ;;  %p1734_p7 = scmp.lt.s32.totalorder %s27_s3, %s27_s3 }
  0x31   :  { %p1730_p6 = scmp.ne.s32.totalorder %s27_s3, %s1729_s5  ;;  %p1735_p8 = scmp.lt.s32.totalorder %s1729_s5, %s1729_s5 }
  0x33   :  { %p1736_p9 = por %p1735_p8, %p1734_p7 }
  0x35   :  { %p1737_p10 = pnand %p1736_p9, %p1730_p6 }
  0x37   :  { %1740 = shalt.err (!%p1737_p10)
}
  0x38   :  { %s1860_s15 = smov 512   ;;  %s1861_s18 = smov 32  }
  0x39   :  { %32 = dma.hbm_to_vmem [thread:$0]  %s2004_s0, 1024, %s27_s3, [#allocation3], %s1860_s15, %s1860_s15, %s1861_s18  }
  0x3a   :  { %s1862_s21 = smov [#allocation7]   ;;  %s1863_s23 = smov [#allocation10]  }
  0x3b   :  { %s51_s22 = sshll.u32 %s1862_s21, 4  ;;  %s73_s24 = sshll.u32 %s1863_s23, 4  ;;  %s52_s22 = int_to_ptr.vmem [resolvable:$true] %s51_s22  ;;  %s74_s24 = int_to_ptr.vmem [resolvable:$true] %s73_s24 }
  0x3c   :  { %s1749_s7 = scalar_lea.vmem %s52_s22, 16  ;;  %s1753_s16 = scalar_lea.vmem %s52_s22, 32 }
  0x3d   :  { %p1750_p11 = scmp.ne.s32.totalorder %s52_s22, %s1749_s7  ;;  %p1754_p12 = scmp.lt.s32.totalorder %s52_s22, %s52_s22 }
  0x3e   :  { %p1755_p13 = scmp.lt.s32.totalorder %s1753_s16, %s1749_s7 }
  0x40   :  { %p1756_p0 = por %p1755_p13, %p1754_p12 }
  0x42   :  { %p1757_p1 = pnand %p1756_p0, %p1750_p11 }
  0x44   :  { %1760 = shalt.err (!%p1757_p1)
}
  0x45   :  { %54 = dma.hbm_to_vmem [thread:$0]  %s2006_s2, 16, %s52_s22, [#allocation6]  }
  0x46   :  { %s1769_s26 = scalar_lea.vmem %s74_s24, 16  ;;  %s1773_s0 = scalar_lea.vmem %s74_s24, 32 }
  0x47   :  { %p1770_p2 = scmp.ne.s32.totalorder %s74_s24, %s1769_s26  ;;  %p1774_p3 = scmp.lt.s32.totalorder %s74_s24, %s74_s24 }
  0x48   :  { %p1775_p4 = scmp.lt.s32.totalorder %s1773_s0, %s1769_s26 }
  0x4a   :  { %p1776_p5 = por %p1775_p4, %p1774_p3 }
  0x4c   :  { %p1777_p6 = pnand %p1776_p5, %p1770_p2 }
  0x4e   :  { %1780 = shalt.err (!%p1777_p6)
}
  0x4f   :  { %76 = dma.hbm_to_vmem [thread:$0]  %s2008_s4, 16, %s74_s24, [#allocation9]  }
  0x50   :  { %s1864_s28 = smov [#allocation13]   ;;  %s1865_s30 = smov [#allocation16]  }
  0x51   :  { %s95_s29 = sshll.u32 %s1864_s28, 4  ;;  %s117_s11 = sshll.u32 %s1865_s30, 4  ;;  %s96_s29 = int_to_ptr.vmem [resolvable:$true] %s95_s29  ;;  %s118_s11 = int_to_ptr.vmem [resolvable:$true] %s117_s11 }
  0x52   :  { %s1789_s3 = scalar_lea.vmem %s96_s29, 16  ;;  %s1793_s2 = scalar_lea.vmem %s96_s29, 32 }
  0x53   :  { %p1790_p7 = scmp.ne.s32.totalorder %s96_s29, %s1789_s3  ;;  %p1794_p8 = scmp.lt.s32.totalorder %s96_s29, %s96_s29 }
  0x54   :  { %p1795_p9 = scmp.lt.s32.totalorder %s1793_s2, %s1789_s3 }
  0x56   :  { %p1796_p10 = por %p1795_p9, %p1794_p8 }
  0x58   :  { %p1797_p11 = pnand %p1796_p10, %p1790_p7 }
  0x5a   :  { %1800 = shalt.err (!%p1797_p11)
}
  0x5b   :  { %98 = dma.hbm_to_vmem [thread:$0]  %s2010_s6, 16, %s96_s29, [#allocation12]  }
  0x5c   :  { %s1809_s14 = scalar_lea.vmem %s118_s11, 16  ;;  %s1813_s4 = scalar_lea.vmem %s118_s11, 32 }
  0x5d   :  { %p1810_p12 = scmp.ne.s32.totalorder %s118_s11, %s1809_s14  ;;  %p1814_p13 = scmp.lt.s32.totalorder %s118_s11, %s118_s11 }
  0x5e   :  { %p1815_p0 = scmp.lt.s32.totalorder %s1813_s4, %s1809_s14 }
  0x60   :  { %p1816_p1 = por %p1815_p0, %p1814_p13 }
  0x62   :  { %p1817_p2 = pnand %p1816_p1, %p1810_p12 }
  0x64   :  { %1820 = shalt.err (!%p1817_p2)
}
  0x65   :  { %120 = dma.hbm_to_vmem [thread:$0]  %s2012_s8, 16, %s118_s11, [#allocation15]  }
  0x66   :  { %1841 = dma.done.wait [#allocation3], 1024  }
  0x67   :  { %1842 = vsyncadd [#allocation3], 4294966272 }
  0x68   :  { %1843 = dma.done.wait [#allocation6], 8208  }
  0x69   :  { %1844 = vsyncadd [#allocation6], 4294959088 }
  0x6a   :  { %1845 = dma.done.wait [#allocation9], 1040  }
  0x6b   :  { %1846 = vsyncadd [#allocation9], 4294966256 }
  0x6c   :  { %1847 = dma.done.wait [#allocation12], 1040  }
  0x6d   :  { %1848 = vsyncadd [#allocation12], 4294966256 }
  0x6e   :  { %1849 = dma.done.wait [#allocation15], 1040  }
  0x6f   :  { %1850 = vsyncadd [#allocation15], 4294966256  ;;  %v1553_v0 = vld [vmem:[#allocation5 + $0x78] sm:$0xff]   ;;  %v1557_v4 = vld [vmem:[#allocation5 + $0x70] sm:$0xff]   ;;  %vm1867_vm0 = vmmov 0   ;;  %s1868_s20 = smov [#allocation17]  }
  0x70   :  { %v1554_v1 = vld [vmem:[#allocation5 + $0xf8] sm:$0xff]   ;;  %1360 = vmatprep.subr.bf16.mxu0 %v1553_v0  ;;  %v1558_v5 = vld [vmem:[#allocation5 + $0xf0] sm:$0xff]   ;;  %v1561_v8 = vld [vmem:[#allocation5 + $0x68] sm:$0xff]   ;;  %s1244_s21 = sshll.u32 %s1868_s20, 4  ;;  %s1245_s21 = int_to_ptr.vmem [resolvable:$true] %s1244_s21 }
  0x71   :  { %v1555_v2 = vld [vmem:[#allocation5 + $0x38] sm:$0xff]   ;;  %1382 = vmatprep.subr.bf16.mxu1 %v1554_v1  ;;  %v1559_v6 = vld [vmem:[#allocation5 + $0x30] sm:$0xff]   ;;  %v1562_v9 = vld [vmem:[#allocation5 + $0xe8] sm:$0xff]   ;;  %s1821_s22 = scalar_lea.vmem %s1245_s21, 256  ;;  %p1826_p4 = scmp.lt.s32.totalorder %s1245_s21, %s1245_s21 }
  0x72   :  { %v1556_v3 = vld [vmem:[#allocation5 + $0xb8] sm:$0xff]   ;;  %1361 = vmatpush3.bf16.msra.mxu0 %v1555_v2  ;;  %v1560_v7 = vld [vmem:[#allocation5 + $0xb0] sm:$0xff]   ;;  %v1563_v10 = vld [vmem:[#allocation5 + $0x28] sm:$0xff]   ;;  %p1822_p3 = scmp.ne.s32.totalorder %s1245_s21, %s1821_s22  ;;  %p1827_p5 = scmp.lt.s32.totalorder %s1821_s22, %s1821_s22 }
  0x73   :  { %1383 = vmatpush3.bf16.msra.mxu1 %v1556_v3  ;;  %1362 = vmatprep.subr.bf16.mxu0 %v1557_v4  ;;  %v1564_v11 = vld [vmem:[#allocation5 + $0xa8] sm:$0xff]   ;;  %v1565_v12 = vld [vmem:[#allocation5 + $0x60] sm:$0xff]   ;;  %v1569_v16 = vld [vmem:[#allocation5 + $0x58] sm:$0xff]  }
  0x74   :  { %1384 = vmatprep.subr.bf16.mxu1 %v1558_v5  ;;  %v1566_v13 = vld [vmem:[#allocation5 + $0xe0] sm:$0xff]   ;;  %v1570_v17 = vld [vmem:[#allocation5 + $0xd8] sm:$0xff]   ;;  %v1573_v20 = vld [vmem:[#allocation5 + $0x50] sm:$0xff]   ;;  %p1828_p6 = por %p1827_p5, %p1826_p4 }
  0x75   :  { %v1567_v14 = vld [vmem:[#allocation5 + $0x20] sm:$0xff]   ;;  %v1571_v18 = vld [vmem:[#allocation5 + $0x18] sm:$0xff]   ;;  %v1574_v21 = vld [vmem:[#allocation5 + $0xd0] sm:$0xff]  }
  0x76   :  { %1363 = vmatpush3.bf16.msra.mxu0 %v1559_v6  ;;  %v1568_v15 = vld [vmem:[#allocation5 + $0xa0] sm:$0xff]   ;;  %v1572_v19 = vld [vmem:[#allocation5 + $0x98] sm:$0xff]   ;;  %v1575_v22 = vld [vmem:[#allocation5 + $0x10] sm:$0xff]   ;;  %p1829_p7 = pnand %p1828_p6, %p1822_p3 }
  0x77   :  { %1385 = vmatpush3.bf16.msra.mxu1 %v1560_v7  ;;  %1364 = vmatprep.subr.bf16.mxu0 %v1561_v8  ;;  %v1576_v23 = vld [vmem:[#allocation5 + $0x90] sm:$0xff]   ;;  %v1577_v24 = vld [vmem:[#allocation5 + $0x48] sm:$0xff]   ;;  %v1581_v28 = vld [vmem:[#allocation5 + $0x40] sm:$0xff]  }
  0x78   :  { %1386 = vmatprep.subr.bf16.mxu1 %v1562_v9  ;;  %v1578_v25 = vld [vmem:[#allocation5 + $0xc8] sm:$0xff]   ;;  %v1582_v29 = vld [vmem:[#allocation5 + $0xc0] sm:$0xff]   ;;  %v1585_v40 = vld [vmem:[#allocation5 + $0x178] sm:$0xff]  }
  0x79   :  { %v1579_v26 = vld [vmem:[#allocation5 + $0x8] sm:$0xff]   ;;  %v1583_v30 = vld [vmem:[#allocation5] sm:$0xff]   ;;  %v1586_v41 = vld [vmem:[#allocation5 + $0x1f8] sm:$0xff]  }
  0x7a   :  { %1365 = vmatpush3.bf16.msra.mxu0 %v1563_v10  ;;  %v1580_v27 = vld [vmem:[#allocation5 + $0x88] sm:$0xff]   ;;  %v1584_v31 = vld [vmem:[#allocation5 + $0x80] sm:$0xff]   ;;  %v1587_v42 = vld [vmem:[#allocation5 + $0x138] sm:$0xff]  }
  0x7b   :  { %1387 = vmatpush3.bf16.msra.mxu1 %v1564_v11  ;;  %1366 = vmatprep.subr.bf16.mxu0 %v1565_v12  ;;  %v151_v32 = vld [vmem:[#allocation2] sm:$0xff]  ;;  %v152_v34 = vld [vmem:[#allocation2 + $0x8] sm:$0xff]  ;;  %v1588_v43 = vld [vmem:[#allocation5 + $0x1b8] sm:$0xff]  }
  0x7c   :  { %1388 = vmatprep.subr.bf16.mxu1 %v1566_v13  ;;  %v155_v33 = vld [vmem:[#allocation2 + $0x20] sm:$0xff]  ;;  %v156_v37 = vld [vmem:[#allocation2 + $0x28] sm:$0xff]  ;;  %v1589_v44 = vld [vmem:[#allocation5 + $0x170] sm:$0xff]  }
  0x7d   :  { %v1261_v35 = vcombine.low %v151_v32, %v155_v33  ;;  %v1262_v36 = vcombine.high %v151_v32, %v155_v33  ;;  %v1263_v38 = vcombine.low %v152_v34, %v156_v37  ;;  %v1264_v39 = vcombine.high %v152_v34, %v156_v37  ;;  %v1590_v45 = vld [vmem:[#allocation5 + $0x1f0] sm:$0xff]   ;;  %v1593_v48 = vld [vmem:[#allocation5 + $0x168] sm:$0xff]   ;;  %v1597_v52 = vld [vmem:[#allocation5 + $0x160] sm:$0xff]  }
  0x7e   :  { %1367 = vmatpush3.bf16.msra.mxu0 %v1567_v14  ;;  %v1591_v46 = vld [vmem:[#allocation5 + $0x130] sm:$0xff]   ;;  %v1594_v49 = vld [vmem:[#allocation5 + $0x1e8] sm:$0xff]   ;;  %v1598_v53 = vld [vmem:[#allocation5 + $0x1e0] sm:$0xff]  }
  0x7f   :  { %1389 = vmatpush3.bf16.msra.mxu1 %v1568_v15  ;;  %1368 = vmatprep.subr.bf16.mxu0 %v1569_v16  ;;  %v1592_v47 = vld [vmem:[#allocation5 + $0x1b0] sm:$0xff]   ;;  %v1595_v50 = vld [vmem:[#allocation5 + $0x128] sm:$0xff]   ;;  %v1599_v54 = vld [vmem:[#allocation5 + $0x120] sm:$0xff]  }
  0x80   :  { %1390 = vmatprep.subr.bf16.mxu1 %v1570_v17  ;;  %750 = vmatprep.mubr.bf16.mxu0 %v1262_v36  ;;  %v1596_v51 = vld [vmem:[#allocation5 + $0x1a8] sm:$0xff]   ;;  %v1600_v55 = vld [vmem:[#allocation5 + $0x1a0] sm:$0xff]   ;;  %v1601_v56 = vld [vmem:[#allocation5 + $0x158] sm:$0xff]   ;;  %v1866_v17 = vmov 0.0  }
  0x81   :  { %791 = vmatprep.mubr.bf16.mxu1 %v1264_v39  ;;  %v1602_v57 = vld [vmem:[#allocation5 + $0x1d8] sm:$0xff]   ;;  %v1605_v60 = vld [vmem:[#allocation5 + $0x150] sm:$0xff]   ;;  %v1609_v0 = vld [vmem:[#allocation5 + $0x148] sm:$0xff]  }
  0x82   :  { %1369 = vmatpush3.bf16.msra.mxu0 %v1571_v18  ;;  %v1603_v58 = vld [vmem:[#allocation5 + $0x118] sm:$0xff]   ;;  %v1606_v61 = vld [vmem:[#allocation5 + $0x1d0] sm:$0xff]   ;;  %v1610_v1 = vld [vmem:[#allocation5 + $0x1c8] sm:$0xff]  }
  0x83   :  { %1391 = vmatpush3.bf16.msra.mxu1 %v1572_v19  ;;  %1370 = vmatprep.subr.bf16.mxu0 %v1573_v20  ;;  %v1604_v59 = vld [vmem:[#allocation5 + $0x198] sm:$0xff]   ;;  %v1607_v62 = vld [vmem:[#allocation5 + $0x110] sm:$0xff]   ;;  %v1611_v2 = vld [vmem:[#allocation5 + $0x108] sm:$0xff]  }
  0x84   :  { %1392 = vmatprep.subr.bf16.mxu1 %v1574_v21  ;;  %v1608_v63 = vld [vmem:[#allocation5 + $0x190] sm:$0xff]   ;;  %v1612_v3 = vld [vmem:[#allocation5 + $0x188] sm:$0xff]   ;;  %v1613_v4 = vld [vmem:[#allocation5 + $0x140] sm:$0xff]  }
  0x85   :  { %v1614_v5 = vld [vmem:[#allocation5 + $0x1c0] sm:$0xff]   ;;  %v153_v8 = vld [vmem:[#allocation2 + $0x10] sm:$0xff]  ;;  %v154_v12 = vld [vmem:[#allocation2 + $0x18] sm:$0xff] }
  0x86   :  { %1371 = vmatpush3.bf16.msra.mxu0 %v1575_v22  ;;  %v1615_v6 = vld [vmem:[#allocation5 + $0x100] sm:$0xff]   ;;  %v157_v9 = vld [vmem:[#allocation2 + $0x30] sm:$0xff]  ;;  %v158_v13 = vld [vmem:[#allocation2 + $0x38] sm:$0xff] }
  0x87   :  { %1393 = vmatpush3.bf16.msra.mxu1 %v1576_v23  ;;  %1372 = vmatprep.subr.bf16.mxu0 %v1577_v24  ;;  %v1616_v7 = vld [vmem:[#allocation5 + $0x180] sm:$0xff]   ;;  %v1265_v10 = vcombine.low %v153_v8, %v157_v9  ;;  %v1266_v11 = vcombine.high %v153_v8, %v157_v9  ;;  %v1267_v14 = vcombine.low %v154_v12, %v158_v13  ;;  %v1618_v18 = vld [vmem:[#allocation8 + $0x30] sm:$0xff]   ;;  %v1619_v19 = vld [vmem:[#allocation8 + $0x28] sm:$0xff]  }
  0x88   :  { %1394 = vmatprep.subr.bf16.mxu1 %v1578_v25  ;;  %v1268_v15 = vcombine.high %v154_v12, %v158_v13  ;;  %v1617_v16 = vld [vmem:[#allocation8 + $0x38] sm:$0xff]   ;;  %v1620_v20 = vld [vmem:[#allocation8 + $0x20] sm:$0xff]   ;;  %v1622_v22 = vld [vmem:[#allocation8 + $0x10] sm:$0xff]  }
  0x89   :  { %v1621_v21 = vld [vmem:[#allocation8 + $0x18] sm:$0xff]   ;;  %v1623_v23 = vld [vmem:[#allocation8 + $0x8] sm:$0xff]   ;;  %v1624_v24 = vld [vmem:[#allocation8] sm:$0xff]  }
  0x8a   :  { %1373 = vmatpush3.bf16.msra.mxu0 %v1579_v26  ;;  %v1625_v25 = vld [vmem:[#allocation11 + $0x38] sm:$0xff]   ;;  %v1626_v26 = vld [vmem:[#allocation11 + $0x30] sm:$0xff]   ;;  %v1636_v8 = vld [vmem:[#allocation14 + $0x20] sm:$0xff]  }
  0x8b   :  { %1395 = vmatpush3.bf16.msra.mxu1 %v1580_v27  ;;  %1374 = vmatprep.subr.bf16.mxu0 %v1581_v28  ;;  %v1627_v27 = vld [vmem:[#allocation11 + $0x28] sm:$0xff]   ;;  %v1628_v28 = vld [vmem:[#allocation11 + $0x20] sm:$0xff]   ;;  %v1260_v37 = vld [vmem:[#allocation7] ss:$0 sm:$0xff] }
  0x8c   :  { %1396 = vmatprep.subr.bf16.mxu1 %v1582_v29  ;;  %v1629_v29 = vld [vmem:[#allocation11 + $0x18] sm:$0xff]  }
  0x8d   :  { %v1637_v9 = vld [vmem:[#allocation14 + $0x18] sm:$0xff]  }
  0x8e   :  { %1375 = vmatpush3.bf16.msra.mxu0 %v1583_v30 }
  0x8f   :  { %1397 = vmatpush3.bf16.msra.mxu1 %v1584_v31  ;;  %1404 = vmatprep.subr.bf16.mxu0 %v1585_v40 }
  0x90   :  { %1426 = vmatprep.subr.bf16.mxu1 %v1586_v41 }
  0x91   :  { %751 = vmatmul.mubr.bf16.vlgmr.msra.gmra.mxu0 %v1261_v35 }
  0x92   :  { %792 = vmatmul.mubr.bf16.vlgmr.msra.gmra.mxu1 %v1263_v38  ;;  %1405 = vmatpush3.bf16.msra.mxu0 %v1587_v42 }
  0x93   :  { %1427 = vmatpush3.bf16.msra.mxu1 %v1588_v43  ;;  %1406 = vmatprep.subr.bf16.mxu0 %v1589_v44 }
  0x94   :  { %1428 = vmatprep.subr.bf16.mxu1 %v1590_v45  ;;  %832 = vmatprep.mubr.bf16.mxu0 %v1266_v11 }
  0x95   :  { %873 = vmatprep.mubr.bf16.mxu1 %v1268_v15 }
  0x96   :  { %1407 = vmatpush3.bf16.msra.mxu0 %v1591_v46 }
  0x97   :  { %1429 = vmatpush3.bf16.msra.mxu1 %v1592_v47  ;;  %1408 = vmatprep.subr.bf16.mxu0 %v1593_v48 }
  0x98   :  { %1430 = vmatprep.subr.bf16.mxu1 %v1594_v49 }
  0x9a   :  { %1409 = vmatpush3.bf16.msra.mxu0 %v1595_v50 }
  0x9b   :  { %1431 = vmatpush3.bf16.msra.mxu1 %v1596_v51  ;;  %1410 = vmatprep.subr.bf16.mxu0 %v1597_v52 }
  0x9c   :  { %1432 = vmatprep.subr.bf16.mxu1 %v1598_v53 }
  0x9e   :  { %1411 = vmatpush3.bf16.msra.mxu0 %v1599_v54 }
  0x9f   :  { %1433 = vmatpush3.bf16.msra.mxu1 %v1600_v55  ;;  %1412 = vmatprep.subr.bf16.mxu0 %v1601_v56 }
  0xa0   :  { %1434 = vmatprep.subr.bf16.mxu1 %v1602_v57 }
  0xa2   :  { %1413 = vmatpush3.bf16.msra.mxu0 %v1603_v58 }
  0xa3   :  { %1435 = vmatpush3.bf16.msra.mxu1 %v1604_v59  ;;  %1414 = vmatprep.subr.bf16.mxu0 %v1605_v60 }
  0xa4   :  { %1436 = vmatprep.subr.bf16.mxu1 %v1606_v61 }
  0xa6   :  { %1415 = vmatpush3.bf16.msra.mxu0 %v1607_v62 }
  0xa7   :  { %1437 = vmatpush3.bf16.msra.mxu1 %v1608_v63  ;;  %1416 = vmatprep.subr.bf16.mxu0 %v1609_v0 }
  0xa8   :  { %1438 = vmatprep.subr.bf16.mxu1 %v1610_v1 }
  0xaa   :  { %1417 = vmatpush3.bf16.msra.mxu0 %v1611_v2  ;;  %v1630_v2 = vld [vmem:[#allocation11 + $0x10] sm:$0xff]  }
  0xab   :  { %1439 = vmatpush3.bf16.msra.mxu1 %v1612_v3  ;;  %1418 = vmatprep.subr.bf16.mxu0 %v1613_v4  ;;  %v1631_v3 = vld [vmem:[#allocation11 + $0x8] sm:$0xff]   ;;  %v1632_v4 = vld [vmem:[#allocation11] sm:$0xff]  }
  0xac   :  { %1440 = vmatprep.subr.bf16.mxu1 %v1614_v5  ;;  %v1633_v5 = vld [vmem:[#allocation14 + $0x38] sm:$0xff]  }
  0xae   :  { %1419 = vmatpush3.bf16.msra.mxu0 %v1615_v6  ;;  %v1634_v6 = vld [vmem:[#allocation14 + $0x30] sm:$0xff]  }
  0xaf   :  { %1441 = vmatpush3.bf16.msra.mxu1 %v1616_v7  ;;  %1475 = vmatprep.subr.bf16.mxu0 %v1866_v17  ;;  %v1635_v7 = vld [vmem:[#allocation14 + $0x28] sm:$0xff]  }
  0xb0   :  { %1495 = vmatprep.subr.bf16.mxu1 %v1866_v17 }
  0xb1   :  { %833 = vmatmul.mubr.bf16.vlgmr.msra.gmra.mxu0 %v1265_v10  ;;  %v1333_v10 = vld [vmem:[#allocation10] ss:$0 sm:$0xff] }
  0xb2   :  { %874 = vmatmul.mubr.bf16.vlgmr.msra.gmra.mxu1 %v1267_v14  ;;  %1476 = vmatpush3.bf16.msra.mxu0 %v1617_v16 }
  0xb3   :  { %1477 = vmatprep.subr.bf16.mxu0 %v1866_v17  ;;  %1491 = vmatprep.mubr.msk.bf16.mxu0 %vm1867_vm0, %v1866_v17 }
  0xb4   :  { %1511 = vmatprep.mubr.msk.bf16.mxu1 %vm1867_vm0, %v1866_v17  ;;  %1496 = vmatpush3.bf16.msra.mxu1 %v1625_v25 }
  0xb5   :  { %1497 = vmatprep.subr.bf16.mxu1 %v1866_v17 }
  0xb6   :  { %1478 = vmatpush3.bf16.msra.mxu0 %v1618_v18 }
  0xb7   :  { %1479 = vmatprep.subr.bf16.mxu0 %v1866_v17 }
  0xb8   :  { %1498 = vmatpush3.bf16.msra.mxu1 %v1626_v26 }
  0xb9   :  { %1499 = vmatprep.subr.bf16.mxu1 %v1866_v17 }
  0xba   :  { %1480 = vmatpush3.bf16.msra.mxu0 %v1619_v19 }
  0xbb   :  { %1481 = vmatprep.subr.bf16.mxu0 %v1866_v17 }
  0xbc   :  { %1500 = vmatpush3.bf16.msra.mxu1 %v1627_v27 }
  0xbd   :  { %1501 = vmatprep.subr.bf16.mxu1 %v1866_v17 }
  0xbe   :  { %1482 = vmatpush3.bf16.msra.mxu0 %v1620_v20 }
  0xbf   :  { %1483 = vmatprep.subr.bf16.mxu0 %v1866_v17 }
  0xc0   :  { %1502 = vmatpush3.bf16.msra.mxu1 %v1628_v28 }
  0xc1   :  { %1503 = vmatprep.subr.bf16.mxu1 %v1866_v17 }
  0xc2   :  { %1484 = vmatpush3.bf16.msra.mxu0 %v1621_v21  ;;  %v1638_v21 = vld [vmem:[#allocation14 + $0x10] sm:$0xff]  }
  0xc3   :  { %1485 = vmatprep.subr.bf16.mxu0 %v1866_v17 }
  0xc4   :  { %1504 = vmatpush3.bf16.msra.mxu1 %v1629_v29 }
  0xc5   :  { %1505 = vmatprep.subr.bf16.mxu1 %v1866_v17 }
  0xc6   :  { %1486 = vmatpush3.bf16.msra.mxu0 %v1622_v22  ;;  %v1639_v22 = vld [vmem:[#allocation14 + $0x8] sm:$0xff]  }
  0xc7   :  { %1487 = vmatprep.subr.bf16.mxu0 %v1866_v17 }
  0xc8   :  { %1506 = vmatpush3.bf16.msra.mxu1 %v1630_v2 }
  0xc9   :  { %1507 = vmatprep.subr.bf16.mxu1 %v1866_v17 }
  0xca   :  { %1488 = vmatpush3.bf16.msra.mxu0 %v1623_v23  ;;  %v1640_v23 = vld [vmem:[#allocation14] sm:$0xff]  }
  0xcb   :  { %1489 = vmatprep.subr.bf16.mxu0 %v1866_v17 }
  0xcc   :  { %1508 = vmatpush3.bf16.msra.mxu1 %v1631_v3 }
  0xcd   :  { %1509 = vmatprep.subr.bf16.mxu1 %v1866_v17 }
  0xce   :  { %1490 = vmatpush3.bf16.msra.mxu0 %v1624_v24  ;;  %v1342_v24 = vld [vmem:[#allocation13] ss:$0 sm:$0xff] }
  0xcf   :  { %1515 = vmatprep.subr.bf16.mxu0 %v1866_v17 }
  0xd0   :  { %1510 = vmatpush3.bf16.msra.mxu1 %v1632_v4 }
 0x151   :  { %v1376_v30 = vpop.f32.mrf.mxu0 }
 0x152   :  { %v1398_v31 = vpop.f32.mrf.mxu1 }
 0x153   :  { %v1377_v32 = vpop.f32.mrf.mxu0 }
 0x154   :  { %v1399_v33 = vpop.f32.mrf.mxu1  ;;  %v1378_v35 = vadd.f32 %v1377_v32, %v1376_v30 }
 0x155   :  { %v1379_v34 = vpop.f32.mrf.mxu0  ;;  %v1400_v40 = vadd.f32 %v1399_v33, %v1398_v31 }
 0x156   :  { %v1401_v36 = vpop.f32.mrf.mxu1  ;;  %v753_v39 = vadd.f32 %v1378_v35, %v1260_v37  ;;  %v1227_v35 = vld [vmem:[%s2013_s9] sm:$0xff] }
 0x157   :  { %v1380_v38 = vpop.f32.mrf.mxu0  ;;  %vm1229_vm1 = vcmp.eq.f32.partialorder %v1227_v35, 0.0 }
 0x158   :  { %v1381_v41 = vadd.f32 %v1380_v38, %v1379_v34  ;;  %v1402_v42 = vpop.f32.mrf.mxu1  ;;  %v794_v46 = vadd.f32 %v1400_v40, %v753_v39  ;;  %v1351_v34 = vld [vmem:[#allocation16] ss:$0 sm:$0xff]  ;;  %v1228_v38 = vld [vmem:[%s2013_s9 + $0x8] sm:$0xff] }
 0x159   :  { %v1403_v51 = vadd.f32 %v1402_v42, %v1401_v36  ;;  %vm1230_vm4 = vcmp.eq.f32.partialorder %v1228_v38, 0.0 }
 0x15a   :  { %v756_v47 = vadd.f32 %v1381_v41, %v1260_v37 }
 0x15c   :  { %v797_v55 = vadd.f32 %v1403_v51, %v756_v47 }
 0x171   :  { %v1420_v43 = vpop.f32.mrf.mxu0 }
 0x172   :  { %v1442_v44 = vpop.f32.mrf.mxu1 }
 0x173   :  { %v1421_v45 = vpop.f32.mrf.mxu0 }
 0x174   :  { %v1422_v48 = vadd.f32 %v1421_v45, %v1420_v43  ;;  %v1443_v49 = vpop.f32.mrf.mxu1 }
 0x175   :  { %v1423_v50 = vpop.f32.mrf.mxu0  ;;  %v1444_v56 = vadd.f32 %v1443_v49, %v1442_v44 }
 0x176   :  { %v835_v52 = vadd.f32 %v1422_v48, %v794_v46  ;;  %v1445_v53 = vpop.f32.mrf.mxu1 }
 0x177   :  { %v1424_v54 = vpop.f32.mrf.mxu0 }
 0x178   :  { %v1425_v57 = vadd.f32 %v1424_v54, %v1423_v50  ;;  %v1446_v58 = vpop.f32.mrf.mxu1  ;;  %v876_v59 = vadd.f32 %v1444_v56, %v835_v52 }
 0x179   :  { %v1447_v61 = vadd.f32 %v1446_v58, %v1445_v53 }
 0x17a   :  { %v838_v60 = vadd.f32 %v1425_v57, %v797_v55  ;;  %v882_v63 = vmax.f32 %v876_v59, 0.0 }
 0x17c   :  { %v879_v62 = vadd.f32 %v1447_v61, %v838_v60 }
 0x17e   :  { %v883_v0 = vmax.f32 %v879_v62, 0.0 }
 0x180   :  { %v884_v1 = vpack.c.bf16 %v883_v0, %v882_v63 }
 0x182   :  { %1492 = vmatmul.mubr.bf16.vlgmr.msra.gmra.mxu0 %v884_v1 }
 0x183   :  { %1531 = vmatprep.mubr.msk.bf16.mxu0 %vm1867_vm0, %v1866_v17  ;;  %1516 = vmatpush3.bf16.msra.mxu0 %v1633_v5 }
 0x184   :  { %1517 = vmatprep.subr.bf16.mxu0 %v1866_v17 }
 0x187   :  { %1518 = vmatpush3.bf16.msra.mxu0 %v1634_v6 }
 0x188   :  { %1519 = vmatprep.subr.bf16.mxu0 %v1866_v17 }
 0x18b   :  { %1520 = vmatpush3.bf16.msra.mxu0 %v1635_v7 }
 0x18c   :  { %1521 = vmatprep.subr.bf16.mxu0 %v1866_v17 }
 0x18f   :  { %1522 = vmatpush3.bf16.msra.mxu0 %v1636_v8 }
 0x190   :  { %1523 = vmatprep.subr.bf16.mxu0 %v1866_v17 }
 0x193   :  { %1524 = vmatpush3.bf16.msra.mxu0 %v1637_v9 }
 0x194   :  { %1525 = vmatprep.subr.bf16.mxu0 %v1866_v17 }
 0x197   :  { %1526 = vmatpush3.bf16.msra.mxu0 %v1638_v21 }
 0x198   :  { %1527 = vmatprep.subr.bf16.mxu0 %v1866_v17 }
 0x19b   :  { %1528 = vmatpush3.bf16.msra.mxu0 %v1639_v22 }
 0x19c   :  { %1529 = vmatprep.subr.bf16.mxu0 %v1866_v17 }
 0x19f   :  { %1530 = vmatpush3.bf16.msra.mxu0 %v1640_v23 }
 0x242   :  { %v990_v11 = vpop.f32.mrf.mxu0 }
 0x243   :  { %v991_v13 = vadd.f32 %v1333_v10, %v990_v11 }
 0x244   :  { %v1493_v12 = vpop.f32.mrf.mxu0 }
 0x245   :  { %v997_v18 = vmax.f32 %v991_v13, 0.0 }
 0x246   :  { %v993_v14 = vpop.f32.mrf.mxu0 }
 0x247   :  { %v994_v15 = vadd.f32 %v1333_v10, %v993_v14 }
 0x248   :  { %v1494_v16 = vpop.f32.mrf.mxu0 }
 0x249   :  { %v998_v19 = vmax.f32 %v994_v15, 0.0 }
 0x24b   :  { %v999_v20 = vpack.c.bf16 %v998_v19, %v997_v18 }
 0x24d   :  { %1512 = vmatmul.mubr.bf16.vlgmr.msra.gmra.mxu1 %v999_v20 }
 0x30d   :  { %v1105_v25 = vpop.f32.mrf.mxu1 }
 0x30e   :  { %v1106_v27 = vadd.f32 %v1342_v24, %v1105_v25 }
 0x30f   :  { %v1513_v26 = vpop.f32.mrf.mxu1 }
 0x310   :  { %v1112_v31 = vmax.f32 %v1106_v27, 0.0 }
 0x311   :  { %v1108_v28 = vpop.f32.mrf.mxu1 }
 0x312   :  { %v1109_v29 = vadd.f32 %v1342_v24, %v1108_v28 }
 0x313   :  { %v1514_v30 = vpop.f32.mrf.mxu1 }
 0x314   :  { %v1113_v32 = vmax.f32 %v1109_v29, 0.0 }
 0x316   :  { %v1114_v33 = vpack.c.bf16 %v1113_v32, %v1112_v31 }
 0x318   :  { %1532 = vmatmul.mubr.bf16.vlgmr.msra.gmra.mxu0 %v1114_v33 }
 0x3d8   :  { %v1220_v36 = vpop.f32.mrf.mxu0 }
 0x3d9   :  { %v1221_v17 = vadd.f32 %v1351_v34, %v1220_v36 }
 0x3da   :  { %v1533_v37 = vpop.f32.mrf.mxu0 }
 0x3db   :  { %vm1231_vm2 = vcmp.eq.f32.partialorder %v1221_v17, 0.0 }
 0x3dc   :  { %vm1233_vm3 = vmor %vm1229_vm1, %vm1231_vm2  ;;  %v1223_v39 = vpop.f32.mrf.mxu0 }
 0x3dd   :  { %v1235_v40 = vsel %vm1233_vm3, -1e+09, %v1221_v17  ;;  %v1224_v41 = vadd.f32 %v1351_v34, %v1223_v39 }
 0x3de   :  { %1237 = vst [vmem:[#allocation17] sm:$0xff] %v1235_v40  ;;  %v1534_v42 = vpop.f32.mrf.mxu0 }
 0x3df   :  { %vm1232_vm5 = vcmp.eq.f32.partialorder %v1224_v41, 0.0 }
 0x3e0   :  { %vm1234_vm6 = vmor %vm1230_vm4, %vm1232_vm5 }
 0x3e1   :  { %v1236_v43 = vsel %vm1234_vm6, -1e+09, %v1224_v41 }
 0x3e2   :  { %1238 = vst [vmem:[#allocation17 + $0x8] sm:$0xff] %v1236_v43 }
 0x3e3   :  { %1832 = shalt.err (!%p1829_p7)
}
 0x3e4   :  { %s1869_s9 = smov 128   ;;  %s1870_s23 = smov 8  }
 0x3e5   :  { %1250 = dma.vmem_to_hbm [thread:$0]  %s1245_s21, 256, %s2014_s10, [#allocation4], %s1869_s9, %s1869_s9, %s1870_s23  }
 0x3e6   :  { %1851 = dma.done.wait [#allocation4], 256  }
 0x3e7   :  { %1852 = vsyncadd [#allocation4], 4294967040 }
 0x3e8   :  { %1254 = vsyncpa [#allocation3], 1 }
 0x3e9   :  { %1255 = vsyncpa [#allocation6], 1 }
 0x3ea   :  { %1256 = vsyncpa [#allocation9], 1 }
 0x3eb   :  { %1257 = vsyncpa [#allocation12], 1 }
 0x3ec   :  { %1258 = vsyncpa [#allocation15], 1 }
 0x3ed   :  { %1259 = vsyncpa [#allocation4], 1 }

</bundles_post_ra>
